<compile_context>
chip_gen: v7x
topology: tpu7x:2x2x1
jax: 0.10.0
libtpu: 0.0.40
codegen_flags: <defaults>
</compile_context>

<pallas_src>
import math

import numpy as np
import jax
import jax.numpy as jnp
from jax.experimental import pallas as pl
from jax.experimental.pallas import tpu as pltpu

LOG2 = math.log(2.0)


# ----------------------------- Pallas kernel --------------------------------
def shifted_softplus_kernel(x_ref, y_ref):
    x = x_ref[...]
    # numerically stable softplus, then shift by log(2)
    y_ref[...] = jnp.maximum(x, 0.0) + jnp.log1p(jnp.exp(-jnp.abs(x))) - LOG2


# ----------------------------- wrapper ---------------------------------------
def shifted_softplus(x, *, lanes=512, max_block_rows=256):
    """Elementwise softplus(x) - log(2) for arbitrary-shaped x."""
    orig_shape = x.shape
    orig_dtype = x.dtype

    flat = jnp.reshape(x, (-1,)).astype(jnp.float32)
    n = int(flat.shape[0])

    # Lane-dense 2-D layout: (rows, lanes) with lanes a multiple of 128.
    rows_needed = max(1, -(-n // lanes))                 # ceil(n / lanes)
    if rows_needed >= max_block_rows:
        block_rows = max_block_rows                      # 256-row tiles
    else:
        block_rows = ((rows_needed + 7) // 8) * 8        # small input: one block
    rows = ((rows_needed + block_rows - 1) // block_rows) * block_rows

    pad = rows * lanes - n
    if pad:
        flat = jnp.pad(flat, (0, pad))
    x2d = flat.reshape(rows, lanes)

    grid = (rows // block_rows,)
    y2d = pl.pallas_call(
        shifted_softplus_kernel,
        out_shape=jax.ShapeDtypeStruct((rows, lanes), jnp.float32),
        grid=grid,
        in_specs=[pl.BlockSpec((block_rows, lanes), lambda i: (i, 0))],
        out_specs=pl.BlockSpec((block_rows, lanes), lambda i: (i, 0)),
        compiler_params=pltpu.CompilerParams(
            dimension_semantics=("parallel",),           # v7x: split grid over 2 TCs
            vmem_limit_bytes=32 * 1024 * 1024,
        ),
    )(x2d)

    y = y2d.reshape(-1)
    if pad:
        y = y[:n]
    return y.reshape(orig_shape).astype(orig_dtype)


# ----------------------------- pure-JAX reference ---------------------------
def reference(x):
    return jax.nn.softplus(x.astype(jnp.float32)) - LOG2


# ----------------------------- main ------------------------------------------
if __name__ == "__main__":
    key = jax.random.PRNGKey(0)
    k1, k2 = jax.random.split(key, 2)

    # small shape consistent with the SchNet/LineEvo use of ShiftedSoftplus
    # (per-edge hidden features, hidden=32)
    x_small = jax.random.normal(k1, (8, 32), jnp.float32) * 4.0
    # larger input to exercise the tiled (multi-block) path and padding
    x_large = jax.random.normal(k2, (1024, 640), jnp.float32) * 4.0

    y_small = shifted_softplus(x_small)
    y_large = shifted_softplus(x_large)
    jax.block_until_ready((y_small, y_large))

    np.testing.assert_allclose(
        np.asarray(y_small), np.asarray(reference(x_small)), rtol=1e-6, atol=1e-6
    )
    np.testing.assert_allclose(
        np.asarray(y_large), np.asarray(reference(x_large)), rtol=1e-6, atol=1e-6
    )

    print("KERNEL_OK")
</pallas_src>

<mosaic_0001>
module attributes {stable_mosaic.version = 11 : i64} {
  func.func @shifted_softplus_kernel(%arg0: i32, %arg1: memref<8x512xf32, #tpu.memory_space<vmem>>, %arg2: memref<8x512xf32, #tpu.memory_space<vmem>>) attributes {dimension_semantics = [#tpu.dimension_semantics<parallel>], iteration_bounds = array<i64: 1>, scalar_prefetch = 0 : i64, scratch_operands = 0 : i64, tpu.core_type = #tpu.core_type<tc>, window_params = [{transform_indices = @transform_0, window_bounds = array<i64: 8, 512>}, {transform_indices = @transform_1, window_bounds = array<i64: 8, 512>}]} {
    %c0 = arith.constant 0 : index
    %c0_0 = arith.constant 0 : index
    %0 = vector.load %arg1[%c0, %c0_0] : memref<8x512xf32, #tpu.memory_space<vmem>>, vector<8x512xf32>
    %cst = arith.constant 0.000000e+00 : f32
    %1 = vector.broadcast %cst : f32 to vector<8x512xf32>
    %2 = arith.maximumf %0, %1 : vector<8x512xf32>
    %3 = math.absf %0 : vector<8x512xf32>
    %cst_1 = arith.constant 0.000000e+00 : f32
    %4 = vector.broadcast %cst_1 : f32 to vector<8x512xf32>
    %5 = arith.subf %4, %3 : vector<8x512xf32>
    %6 = math.exp %5 : vector<8x512xf32>
    %7 = math.log1p %6 : vector<8x512xf32>
    %8 = arith.addf %2, %7 : vector<8x512xf32>
    %cst_2 = arith.constant 0.693147182 : f32
    %9 = vector.broadcast %cst_2 : f32 to vector<8x512xf32>
    %10 = arith.subf %8, %9 : vector<8x512xf32>
    %c0_3 = arith.constant 0 : index
    %c0_4 = arith.constant 0 : index
    %11 = vector.load %arg2[%c0_3, %c0_4] : memref<8x512xf32, #tpu.memory_space<vmem>>, vector<8x512xf32>
    tpu.vector_store %arg2[%c0_3, %c0_4], %10 {strides = array<i32>} : memref<8x512xf32, #tpu.memory_space<vmem>>, vector<8x512xf32>,
    return
  }
  func.func @transform_0(%arg0: i32) -> (i32, i32) {
    %c0_i32 = arith.constant 0 : i32
    %c0_i32_0 = arith.constant 0 : i32
    return %arg0, %c0_i32 : i32, i32
  }
  func.func @transform_1(%arg0: i32) -> (i32, i32) {
    %c0_i32 = arith.constant 0 : i32
    %c0_i32_0 = arith.constant 0 : i32
    return %arg0, %c0_i32 : i32, i32
  }
}

</mosaic_0001>

<bundles_post_ra>
// kernel: tpu_custom_call.1
= control target key start
LH: loop header
LB: loop body
LE: loop exit
PB: predicated region body
PF: predicated region fallthrough
CT: control target
= control target key end

     0   :  { %6 = vsyncpa [#allocation3], 0  ;;  %s236_s0 = inlined_call_operand.hbm [shape: f32[8,512], index: 0, kind: input, shape index: {}]   ;;  %s237_s1 = inlined_call_operand.hbm [shape: f32[8,512], index: 1, kind: output, shape index: {}]  }
   0x1   :  { %7 = vsyncpa [#allocation4], 0  ;;  %s178_s6 = smov [#allocation2]   ;;  %s130_s10 = scalar_lea.hbm %s236_s0, 512 }
   0x2   :  { %s14_s7 = sshll.u32 %s178_s6, 4  ;;  %p131_p0 = scmp.ne.s32.totalorder %s236_s0, %s130_s10  ;;  %s15_s7 = int_to_ptr.vmem [resolvable:$true] %s14_s7 }
   0x3   :  { %p134_p1 = scmp.lt.u32.totalorder %s130_s10, %s236_s0 }
   0x5   :  { %p136_p2 = pnand %p134_p1, %p131_p0 }
   0x7   :  { %139 = shalt.err (!%p136_p2)
}
   0x8   :  { %s140_s15 = scalar_lea.vmem %s15_s7, 512  ;;  %p145_p4 = scmp.lt.s32.totalorder %s15_s7, %s15_s7 }
   0x9   :  { %p141_p3 = scmp.ne.s32.totalorder %s15_s7, %s140_s15  ;;  %p146_p5 = scmp.lt.s32.totalorder %s140_s15, %s140_s15 }
   0xb   :  { %p147_p6 = por %p146_p5, %p145_p4 }
   0xd   :  { %p148_p7 = pnand %p147_p6, %p141_p3 }
   0xf   :  { %151 = shalt.err (!%p148_p7)
}
  0x10   :  { %17 = dma.hbm_to_vmem [thread:$0]  %s236_s0, 512, %s15_s7, [#allocation3]  }
  0x11   :  { %174 = dma.done.wait [#allocation3], 512  }
  0x12   :  { %175 = vsyncadd [#allocation3], 4294966784  ;;  %v202_v0 = vld [vmem:[#allocation2] sm:$0xff]  ;;  %v204_v1 = vld [vmem:[#allocation2 + $0x8] sm:$0xff]  ;;  %s179_s0 = smov [#allocation5]  }
  0x13   :  { %v206_v2 = vld [vmem:[#allocation2 + $0x10] sm:$0xff]  ;;  %v29_v3 = vand.u32 2147483647, %v202_v0  ;;  %v30_v4 = vand.u32 2147483647, %v204_v1  ;;  %v211_v6 = vld [vmem:[#allocation2 + $0x18] sm:$0xff] }
  0x14   :  { %v31_v5 = vand.u32 2147483647, %v206_v2  ;;  %v32_v9 = vand.u32 2147483647, %v211_v6  ;;  %v25_v37 = vmax.f32 %v202_v0, 0.0  ;;  %v26_v43 = vmax.f32 %v204_v1, 0.0 }
  0x15   :  { %v33_v7 = vsub.f32 0.0, %v29_v3  ;;  %v34_v8 = vsub.f32 0.0, %v30_v4  ;;  %v27_v47 = vmax.f32 %v206_v2, 0.0  ;;  %v28_v54 = vmax.f32 %v211_v6, 0.0  ;;  %s99_s18 = sshll.u32 %s179_s0, 4  ;;  %s100_s18 = int_to_ptr.vmem [resolvable:$true] %s99_s18 }
  0x16   :  { %v35_v10 = vsub.f32 0.0, %v31_v5  ;;  %v36_v13 = vsub.f32 0.0, %v32_v9  ;;  %s152_s19 = scalar_lea.vmem %s100_s18, 512  ;;  %p157_p9 = scmp.lt.s32.totalorder %s100_s18, %s100_s18 }
  0x17   :  { %v37_v11 = vmul.f32 1.442695, %v33_v7  ;;  %v39_v12 = vmul.f32 1.442695, %v34_v8  ;;  %p153_p8 = scmp.ne.s32.totalorder %s100_s18, %s152_s19  ;;  %p158_p10 = scmp.lt.s32.totalorder %s152_s19, %s152_s19 }
  0x18   :  { %v41_v14 = vmul.f32 1.442695, %v35_v10  ;;  %v43_v15 = vmul.f32 1.442695, %v36_v13 }
  0x19   :  { %114 = vpow2.f32 %v37_v11  ;;  %p159_p11 = por %p158_p10, %p157_p9 }
  0x1a   :  { %116 = vpow2.f32 %v39_v12 }
  0x1b   :  { %118 = vpow2.f32 %v41_v14  ;;  %p160_p12 = pnand %p159_p11, %p153_p8 }
  0x1c   :  { %120 = vpow2.f32 %v43_v15 }
  0x23   :  { %v115_v16 = vpop.eup %114 }
  0x24   :  { %v117_v17 = vpop.eup %116  ;;  %v45_v18 = vadd.f32 1.0, %v115_v16  ;;  %v48_v23 = vmul.f32 -0.5, %v115_v16  ;;  %v51_v29 = vand.u32 2147483647, %v115_v16 }
  0x25   :  { %v119_v19 = vpop.eup %118  ;;  %v54_v20 = vadd.f32 1.0, %v117_v17  ;;  %v57_v24 = vmul.f32 -0.5, %v117_v17  ;;  %v60_v31 = vand.u32 2147483647, %v117_v17 }
  0x26   :  { %v121_v21 = vpop.eup %120  ;;  %122 = vlog2.f32 %v45_v18  ;;  %v63_v22 = vadd.f32 1.0, %v119_v19  ;;  %v66_v26 = vmul.f32 -0.5, %v119_v19  ;;  %v49_v27 = vadd.f32 1.0, %v48_v23 }
  0x27   :  { %124 = vlog2.f32 %v54_v20  ;;  %v72_v25 = vadd.f32 1.0, %v121_v21  ;;  %v75_v28 = vmul.f32 -0.5, %v121_v21  ;;  %v58_v30 = vadd.f32 1.0, %v57_v24 }
  0x28   :  { %126 = vlog2.f32 %v63_v22  ;;  %v67_v32 = vadd.f32 1.0, %v66_v26  ;;  %v69_v33 = vand.u32 2147483647, %v119_v19  ;;  %v50_v34 = vmul.f32 %v115_v16, %v49_v27 }
  0x29   :  { %128 = vlog2.f32 %v72_v25  ;;  %v76_v35 = vadd.f32 1.0, %v75_v28  ;;  %vm215_vm0 = vcmp.lt.f32.partialorder %v51_v29, 0.0004427343  ;;  %v59_v39 = vmul.f32 %v117_v17, %v58_v30 }
  0x2a   :  { %v78_v40 = vand.u32 2147483647, %v121_v21  ;;  %vm61_vm1 = vcmp.lt.f32.partialorder %v60_v31, 0.0004427343  ;;  %v68_v44 = vmul.f32 %v119_v19, %v67_v32  ;;  %vm70_vm2 = vcmp.lt.f32.partialorder %v69_v33, 0.0004427343 }
  0x2b   :  { %v77_v50 = vmul.f32 %v121_v21, %v76_v35 }
  0x2c   :  { %vm79_vm3 = vcmp.lt.f32.partialorder %v78_v40, 0.0004427343 }
  0x30   :  { %v123_v36 = vpop.eup %122 }
  0x31   :  { %v125_v41 = vpop.eup %124  ;;  %v47_v42 = vmul.f32 0.6931472, %v123_v36 }
  0x32   :  { %v127_v45 = vpop.eup %126  ;;  %v56_v46 = vmul.f32 0.6931472, %v125_v41 }
  0x33   :  { %v53_v48 = vsel %vm215_vm0, %v50_v34, %v47_v42  ;;  %v65_v49 = vmul.f32 0.6931472, %v127_v45  ;;  %v129_v51 = vpop.eup %128 }
  0x34   :  { %v81_v52 = vadd.f32 %v53_v48, %v25_v37  ;;  %v62_v53 = vsel %vm61_vm1, %v59_v39, %v56_v46  ;;  %v74_v57 = vmul.f32 0.6931472, %v129_v51 }
  0x35   :  { %v82_v55 = vadd.f32 %v62_v53, %v26_v43  ;;  %v71_v56 = vsel %vm70_vm2, %v68_v44, %v65_v49 }
  0x36   :  { %v108_v58 = vadd.f32 -0.6931472, %v81_v52  ;;  %v83_v59 = vadd.f32 %v71_v56, %v27_v47  ;;  %v80_v61 = vsel %vm79_vm3, %v77_v50, %v74_v57 }
  0x37   :  { %v109_v60 = vadd.f32 -0.6931472, %v82_v55  ;;  %v84_v63 = vadd.f32 %v80_v61, %v28_v54 }
  0x38   :  { %89 = vst [vmem:[#allocation5] sm:$0xff] %v108_v58  ;;  %v110_v62 = vadd.f32 -0.6931472, %v83_v59 }
  0x39   :  { %90 = vst [vmem:[#allocation5 + $0x8] sm:$0xff] %v109_v60  ;;  %v111_v0 = vadd.f32 -0.6931472, %v84_v63 }
  0x3a   :  { %91 = vst [vmem:[#allocation5 + $0x10] sm:$0xff] %v110_v62 }
  0x3b   :  { %92 = vst [vmem:[#allocation5 + $0x18] sm:$0xff] %v111_v0 }
  0x3c   :  { %163 = shalt.err (!%p160_p12)
}
  0x3d   :  { %s164_s22 = scalar_lea.hbm %s237_s1, 512 }
  0x3e   :  { %p165_p13 = scmp.ne.s32.totalorder %s237_s1, %s164_s22  ;;  %p168_p0 = scmp.lt.u32.totalorder %s164_s22, %s237_s1 }
  0x40   :  { %p170_p1 = pnand %p168_p0, %p165_p13 }
  0x42   :  { %173 = shalt.err (!%p170_p1)
}
  0x43   :  { %102 = dma.vmem_to_hbm [thread:$0]  %s100_s18, 512, %s237_s1, [#allocation4]  }
  0x44   :  { %176 = dma.done.wait [#allocation4], 512  }
  0x45   :  { %177 = vsyncadd [#allocation4], 4294966784 }
  0x46   :  { %106 = vsyncpa [#allocation3], 1 }
  0x47   :  { %107 = vsyncpa [#allocation4], 1 }

</bundles_post_ra>
